<compile_context>
chip_gen: v6e
topology: v6e:2x2x1
jax: 0.10.0
libtpu: 0.0.40
codegen_flags: <defaults>
</compile_context>

<pallas_src>
from functools import partial

import numpy as np
import jax
import jax.numpy as jnp
from jax.experimental import pallas as pl
from jax.experimental.pallas import tpu as pltpu


def _round_up(x, m):
    return ((x + m - 1) // m) * m


def _cdiv(a, b):
    return -(-a // b)


# ----------------------------------------------------------------------------
# Deterministic parameter construction (librosa slaney mel filterbank + hann)
# ----------------------------------------------------------------------------
def _hz_to_mel(f):
    f = np.asarray(f, dtype=np.float64)
    f_sp = 200.0 / 3.0
    mels = f / f_sp
    min_log_hz = 1000.0
    min_log_mel = min_log_hz / f_sp
    logstep = np.log(6.4) / 27.0
    log_reg = f >= min_log_hz
    mels = np.where(log_reg,
                    min_log_mel + np.log(np.maximum(f, 1e-10) / min_log_hz) / logstep,
                    mels)
    return mels


def _mel_to_hz(m):
    m = np.asarray(m, dtype=np.float64)
    f_sp = 200.0 / 3.0
    freqs = f_sp * m
    min_log_hz = 1000.0
    min_log_mel = min_log_hz / f_sp
    logstep = np.log(6.4) / 27.0
    log_reg = m >= min_log_mel
    freqs = np.where(log_reg, min_log_hz * np.exp(logstep * (m - min_log_mel)), freqs)
    return freqs


def librosa_mel_fn(sr, n_fft, n_mels, fmin, fmax):
    """Slaney-normalized mel filterbank, equivalent to librosa.filters.mel."""
    n_freq = n_fft // 2 + 1
    fftfreqs = np.linspace(0.0, sr / 2.0, n_freq)
    mel_pts = np.linspace(_hz_to_mel(fmin), _hz_to_mel(fmax), n_mels + 2)
    mel_f = _mel_to_hz(mel_pts)
    fdiff = np.diff(mel_f)
    ramps = mel_f[:, None] - fftfreqs[None, :]
    lower = -ramps[:-2] / fdiff[:-1, None]
    upper = ramps[2:] / fdiff[1:, None]
    weights = np.maximum(0.0, np.minimum(lower, upper))
    enorm = 2.0 / (mel_f[2:n_mels + 2] - mel_f[:n_mels])
    weights *= enorm[:, None]
    return weights.astype(np.float32)  # [n_mels, n_freq]


def make_window(n_fft, win_length):
    """Periodic hann of win_length, centered inside n_fft (torch.stft behavior)."""
    n = np.arange(win_length, dtype=np.float64)
    hann = 0.5 * (1.0 - np.cos(2.0 * np.pi * n / win_length))
    w = np.zeros(n_fft, dtype=np.float64)
    lpad = (n_fft - win_length) // 2
    w[lpad:lpad + win_length] = hann
    return w


def make_dft_basis(n_fft, window):
    """Windowed real-DFT bases: wcos[n,k], wsin[n,k] (onesided)."""
    n_freq = n_fft // 2 + 1
    nn = np.arange(n_fft, dtype=np.float64)[:, None]      # [n_fft, 1]
    kk = np.arange(n_freq, dtype=np.float64)[None, :]     # [1, n_freq]
    ang = 2.0 * np.pi * nn * kk / n_fft
    wcos = (window[:, None] * np.cos(ang)).astype(np.float32)
    wsin = (-window[:, None] * np.sin(ang)).astype(np.float32)
    return wcos, wsin  # each [n_fft, n_freq]


# ----------------------------------------------------------------------------
# Pallas kernel: in-VMEM frame assembly -> windowed DFT -> power -> energy ->
#                mel -> log clamp, all fused.
#   main_ref  : [1, tm, hop]      hop-strided audio rows for this tile
#   tail_ref  : [1, T_tail, hop]  the S-1 overlap rows into the next tile
#   w_ref     : [n_fft, Kout]     fused DFT basis (compact or zero-padded layout)
#   melT_ref  : [Kmel, mel_pad]   mel filterbank^T (lane/row padded)
#   out_ref   : [1, tm, mel_pad]  cols [0, n_mel) = log-mel, col mel_pad-1 = energy
#   frame_ref : [tm, n_fft]       VMEM scratch holding the assembled frame tile
# ----------------------------------------------------------------------------
def _stft_mel_kernel(main_ref, tail_ref, w_ref, melT_ref, out_ref, frame_ref, *,
                     hop, S, n_freq, freq_half, mel_pad, compact):
    if S == 1:
        # Fallback path: the wrapper already built full frames (hop does not divide n_fft).
        x = main_ref[0]                                                # [tm, n_fft]
    else:
        # Assemble [tm, n_fft] frames from the hop-strided audio: S shifted copies.
        tm = frame_ref.shape[0]
        m = main_ref[0]                                                # [tm, hop]
        t = tail_ref[0]                                                # [T_tail, hop]
        frame_ref[:, 0:hop] = m
        for j in range(1, S):                                          # static unroll
            if tm - j > 0:
                frame_ref[0:tm - j, j * hop:(j + 1) * hop] = m[j:tm, :]
            frame_ref[tm - j:tm, j * hop:(j + 1) * hop] = t[0:j, :]
        x = frame_ref[...]                                             # [tm, n_fft]

    # One wide MXU matmul produces both real and imaginary parts (f32 accumulation).
    xc = x.astype(w_ref.dtype)
    ri = jnp.dot(xc, w_ref[...], preferred_element_type=jnp.float32)   # [tm, Kout]

    if compact:
        # Layout: lanes [0..fh-1] = cos bins 0..fh-1,
        #         lane fh         = Nyquist cos (folded into the zero sin-DC slot),
        #         lanes fh+1..2fh-1 = sin bins 1..fh-1 (pre-shifted -> no roll needed).
        sq = ri * ri                                                   # [tm, 2*fh]
        energy = jnp.sqrt(jnp.sum(sq, axis=-1, keepdims=True)
                          + jnp.float32(n_freq * 1e-9))                # [tm, 1]
        p = sq[:, :freq_half] + sq[:, freq_half:] + jnp.float32(1e-9)  # [tm, fh]
        # lane 0 = cos0^2 + nyq^2 (+eps): never used, melT row 0 is zero (gated).
        mag = jnp.sqrt(p)
    else:
        freq_pad = w_ref.shape[1] // 2
        re = ri[:, :freq_pad]
        im = ri[:, freq_pad:]
        p = re * re + im * im
        col = jax.lax.broadcasted_iota(jnp.int32, (1, freq_pad), 1)
        p = p + jnp.where(col < n_freq, jnp.float32(1e-9), jnp.float32(0.0))
        mag = jnp.sqrt(p)                                              # pad cols -> 0
        energy = jnp.sqrt(jnp.sum(p, axis=-1, keepdims=True))          # [tm, 1]

    mel = jnp.dot(mag.astype(melT_ref.dtype), melT_ref[...],
                  preferred_element_type=jnp.float32)                  # [tm, mel_pad]
    logmel = jnp.log(jnp.maximum(mel, jnp.float32(1e-5)))

    # Pack energy into the last (padded) lane -> single lane-dense store.
    ocol = jax.lax.broadcasted_iota(jnp.int32, logmel.shape, 1)
    out_ref[0] = jnp.where(ocol == mel_pad - 1, energy, logmel)


def _stft_mel_pallas(X, W, melT, *, hop, S, T_tail, tm, n_tiles,
                     n_freq, freq_half, mel_pad, compact):
    """X: [B, R_padded, hop] hop-strided audio (or full frames when S==1).
       Returns [B, n_tiles*tm, mel_pad] (log-mel | ... | energy)."""
    B = X.shape[0]
    n_fft = hop * S
    rows_p = n_tiles * tm

    kern = partial(_stft_mel_kernel, hop=hop, S=S, n_freq=n_freq,
                   freq_half=freq_half, mel_pad=mel_pad, compact=compact)

    return pl.pallas_call(
        kern,
        out_shape=jax.ShapeDtypeStruct((B, rows_p, mel_pad), jnp.float32),
        grid_spec=pltpu.PrefetchScalarGridSpec(
            num_scalar_prefetch=0,
            grid=(B, n_tiles),
            in_specs=[
                # main rows of this tile (auto-pipelined)
                pl.BlockSpec((1, tm, hop), lambda b, i: (b, i, 0)),
                # S-1 overlap rows into the next tile (rounded up to 8 rows)
                pl.BlockSpec((1, T_tail, hop),
                             lambda b, i: (b, (i + 1) * (tm // T_tail), 0)),
                # resident bases (constant block index -> fetched once)
                pl.BlockSpec(W.shape, lambda b, i: (0, 0)),
                pl.BlockSpec(melT.shape, lambda b, i: (0, 0)),
            ],
            out_specs=pl.BlockSpec((1, tm, mel_pad), lambda b, i: (b, i, 0)),
            scratch_shapes=[pltpu.VMEM((tm, n_fft), jnp.float32)],
        ),
        compiler_params=pltpu.CompilerParams(
            dimension_semantics=("parallel", "parallel")),  # megacore / v7x 2-TC sharding
    )(X, X, W, melT)


# ----------------------------------------------------------------------------
# Full TorchSTFT.forward equivalent
# ----------------------------------------------------------------------------
class TorchSTFTPallas:
    def __init__(self, preprocess_config, n_fft=None, f_clamp=True,
                 tm=512, use_bf16=False):
        pc = preprocess_config["preprocessing"]
        self.n_fft = pc["stft"]["filter_length"] if n_fft is None else n_fft
        self.n_mel_channels = pc["mel"]["n_mel_channels"]
        self.sampling_rate = pc["audio"]["sampling_rate"]
        self.hop_length = pc["stft"]["hop_length"]
        self.win_length = min(pc["stft"]["win_length"], self.n_fft)
        self.mel_fmin = pc["mel"]["mel_fmin"]
        self.mel_fmax = pc["mel"]["mel_fmax"] if f_clamp else None
        self.tm = tm

        n_fft = self.n_fft
        self.n_freq = n_fft // 2 + 1
        self.freq_half = n_fft // 2
        self.mel_pad = _round_up(self.n_mel_channels + 1, 128)   # +1 spare lane for energy

        fmax = self.mel_fmax if self.mel_fmax is not None else self.sampling_rate / 2.0
        mel = librosa_mel_fn(self.sampling_rate, n_fft,
                             self.n_mel_channels, self.mel_fmin, fmax)
        window = make_window(n_fft, self.win_length)
        wcos, wsin = make_dft_basis(n_fft, window)
        self.mel_np = mel                                # [n_mel, n_freq]
        self.window_np = window.astype(np.float32)       # [n_fft]

        # Compact lane packing is exact iff the mel weights at DC and Nyquist are ~0
        # (always true for slaney with fmin >= 0, fmax <= sr/2) and n_fft/2 is 128-aligned.
        wmax = float(mel.max()) if mel.size else 1.0
        edge_zero = (float(np.abs(mel[:, 0]).max()) <= 1e-6 * wmax and
                     float(np.abs(mel[:, -1]).max()) <= 1e-6 * wmax)
        self.compact = bool(edge_zero and n_fft % 2 == 0 and self.freq_half % 128 == 0)

        fh = self.freq_half
        if self.compact:
            # [cos_0..cos_{fh-1} | nyq_cos, sin_1..sin_{fh-1}]  -> 2*fh lanes, no in-kernel roll.
            W = np.zeros((n_fft, 2 * fh), dtype=np.float32)
            W[:, :fh] = wcos[:, :fh]
            W[:, fh] = wcos[:, fh]                  # Nyquist cos folded into the zero sin-DC lane
            W[:, fh + 1:2 * fh] = wsin[:, 1:fh]     # sin bins 1..fh-1, pre-aligned with cos lanes
            melT = np.zeros((fh, self.mel_pad), dtype=np.float32)
            melT[1:fh, :self.n_mel_channels] = mel[:, 1:fh].T   # row 0 (DC) forced to zero
        else:
            freq_pad = _round_up(self.n_freq, 128)
            W = np.zeros((n_fft, 2 * freq_pad), dtype=np.float32)
            W[:, :self.n_freq] = wcos
            W[:, freq_pad:freq_pad + self.n_freq] = wsin
            melT = np.zeros((freq_pad, self.mel_pad), dtype=np.float32)
            melT[:self.n_freq, :self.n_mel_channels] = mel.T

        # bf16 matmul inputs give ~2-3x MXU throughput (f32 accumulation kept); default
        # stays f32 so the output matches the PyTorch reference numerics.  Flip
        # use_bf16=True after validating your tolerance (per review correctness note).
        self.basis_dtype = jnp.bfloat16 if use_bf16 else jnp.float32
        self.W = jnp.asarray(W, dtype=self.basis_dtype)
        self.melT = jnp.asarray(melT, dtype=self.basis_dtype)

    def forward(self, y, return_energy=False):
        # y: [B, T] float in [-1, 1]
        y = jnp.asarray(y, jnp.float32)
        B, T = y.shape
        hop, n_fft = self.hop_length, self.n_fft
        pad = (n_fft - hop) // 2
        if T <= pad:
            raise ValueError(f"input length {T} too short for reflect pad {pad}")
        yp = jnp.pad(y, ((0, 0), (pad, pad)), mode="reflect")
        L = yp.shape[1]
        n_frames = 1 + (L - n_fft) // hop

        # Hop-strided audio view; the overlapping frames are assembled INSIDE the kernel.
        if n_fft % hop == 0:
            S = n_fft // hop
            hop_k = hop
            R = n_frames + S - 1                        # R*hop <= L by construction
            X = yp[:, :R * hop_k].reshape(B, R, hop_k)  # contiguous -> free reshape
        else:
            # TODO(synk): non-divisible hop falls back to wrapper framing (4x HBM frame read).
            S = 1
            hop_k = n_fft
            idx = (jnp.arange(n_frames)[:, None] * hop
                   + jnp.arange(n_fft)[None, :])
            X = yp[:, idx]
            R = n_frames

        # Tile size: large tiles amortize per-step overhead; keep >= 2 total grid steps
        # so v7x's 2 TensorCores both get work (v5e/v6e unaffected).
        T_tail = _round_up(max(S - 1, 1), 8)
        tm = max(8, min(self.tm, _round_up(n_frames, 8)))
        tm = _round_up(tm, T_tail)
        n_tiles = _cdiv(n_frames, tm)
        if B * n_tiles < 2 and n_frames > T_tail:
            tm = _round_up(_cdiv(n_frames, 2), T_tail)
            n_tiles = _cdiv(n_frames, tm)
        rows_p = n_tiles * tm

        rows_needed = rows_p + T_tail      # tail block of the last tile must be in-bounds
        if rows_needed > R:
            X = jnp.pad(X, ((0, 0), (0, rows_needed - R), (0, 0)))

        out = _stft_mel_pallas(
            X, self.W, self.melT, hop=hop_k, S=S, T_tail=T_tail, tm=tm,
            n_tiles=n_tiles, n_freq=self.n_freq, freq_half=self.freq_half,
            mel_pad=self.mel_pad, compact=self.compact)

        spec = jnp.transpose(out[:, :n_frames, :self.n_mel_channels], (0, 2, 1))
        energy = out[:, :n_frames, self.mel_pad - 1]
        # TODO(synk): fold this small [B, nf, n_mel] -> [B, n_mel, nf] transpose into the
        # kernel (XLU transpose + [mel_pad, tm] out block) to drop one extra XLA pass.
        if return_energy:
            return spec, energy
        return spec


# ----------------------------------------------------------------------------
# Pure-JAX (rfft) reference used only for validation in __main__
# ----------------------------------------------------------------------------
def _reference_logmel_energy(y, stft):
    hop, n_fft = stft.hop_length, stft.n_fft
    pad = (n_fft - hop) // 2
    yp = jnp.pad(jnp.asarray(y, jnp.float32), ((0, 0), (pad, pad)), mode="reflect")
    n_frames = 1 + (yp.shape[1] - n_fft) // hop
    idx = jnp.arange(n_frames)[:, None] * hop + jnp.arange(n_fft)[None, :]
    frames = yp[:, idx] * jnp.asarray(stft.window_np)[None, None, :]
    fx = jnp.fft.rfft(frames, axis=-1)
    mag = jnp.sqrt(jnp.real(fx) ** 2 + jnp.imag(fx) ** 2 + 1e-9)         # [B, nf, n_freq]
    energy = jnp.sqrt(jnp.sum(mag * mag, axis=-1))                        # [B, nf]
    melspec = jnp.einsum("mf,bnf->bmn", jnp.asarray(stft.mel_np), mag)    # [B, n_mel, nf]
    return jnp.log(jnp.maximum(melspec, 1e-5)), energy


if __name__ == "__main__":
    preprocess_config = {
        "preprocessing": {
            "stft": {"filter_length": 256, "hop_length": 64, "win_length": 256},
            "mel": {"n_mel_channels": 80, "mel_fmin": 0.0, "mel_fmax": 8000.0},
            "audio": {"sampling_rate": 16000},
        }
    }
    stft = TorchSTFTPallas(preprocess_config)

    key = jax.random.PRNGKey(0)
    B, T = 2, 1024
    y = jax.random.uniform(key, (B, T), dtype=jnp.float32, minval=-1.0, maxval=1.0)

    spec, energy = stft.forward(y, return_energy=True)
    spec = jax.block_until_ready(spec)
    energy = jax.block_until_ready(energy)

    assert spec.shape == (B, 80, T // 64), spec.shape
    assert energy.shape == (B, T // 64), energy.shape
    assert bool(jnp.all(jnp.isfinite(spec))) and bool(jnp.all(jnp.isfinite(energy)))

    # Structural / numerical validation against a pure-JAX rfft reference
    # (loose tolerances: they separate "framing/packing correct" from "broken"
    #  while staying robust to the TPU's matmul precision mode).
    ref_spec, ref_energy = _reference_logmel_energy(y, stft)
    spec_err = float(jnp.max(jnp.abs(spec - ref_spec)))
    energy_err = float(jnp.max(jnp.abs(energy - ref_energy) /
                               (jnp.abs(ref_energy) + 1e-6)))
    assert spec_err < 0.15, f"log-mel max abs err {spec_err}"
    assert energy_err < 0.05, f"energy max rel err {energy_err}"

    print("KERNEL_OK")
</pallas_src>

<mosaic_0001>
module attributes {stable_mosaic.version = 11 : i64} {
  func.func @_stft_mel_kernel(%arg0: i32, %arg1: i32, %arg2: memref<1x16x64xf32, #tpu.memory_space<vmem>>, %arg3: memref<1x8x64xf32, #tpu.memory_space<vmem>>, %arg4: memref<256x256xf32, #tpu.memory_space<vmem>>, %arg5: memref<128x128xf32, #tpu.memory_space<vmem>>, %arg6: memref<1x16x128xf32, #tpu.memory_space<vmem>>, %arg7: memref<16x256xf32, #tpu.memory_space<vmem>>) attributes {dimension_semantics = [#tpu.dimension_semantics<parallel>, #tpu.dimension_semantics<parallel>], iteration_bounds = array<i64: 2, 1>, scalar_prefetch = 0 : i64, scratch_operands = 1 : i64, tpu.core_type = #tpu.core_type<tc>, window_params = [{transform_indices = @transform_0, window_bounds = array<i64: 1, 16, 64>}, {transform_indices = @transform_1, window_bounds = array<i64: 1, 8, 64>}, {pipeline_mode = #tpu.pipeline_mode<synchronous>, transform_indices = @transform_2, window_bounds = array<i64: 256, 256>}, {pipeline_mode = #tpu.pipeline_mode<synchronous>, transform_indices = @transform_3, window_bounds = array<i64: 128, 128>}, {transform_indices = @transform_4, window_bounds = array<i64: 1, 16, 128>}]} {
    %c0 = arith.constant 0 : index
    %c0_0 = arith.constant 0 : index
    %c0_1 = arith.constant 0 : index
    %0 = vector.load %arg2[%c0, %c0_0, %c0_1] : memref<1x16x64xf32, #tpu.memory_space<vmem>>, vector<1x16x64xf32>
    %1 = vector.shape_cast %0 : vector<1x16x64xf32> to vector<16x64xf32>
    %c0_2 = arith.constant 0 : index
    %c0_3 = arith.constant 0 : index
    %c0_4 = arith.constant 0 : index
    %2 = vector.load %arg3[%c0_2, %c0_3, %c0_4] : memref<1x8x64xf32, #tpu.memory_space<vmem>>, vector<1x8x64xf32>
    %3 = vector.shape_cast %2 : vector<1x8x64xf32> to vector<8x64xf32>
    %c0_5 = arith.constant 0 : index
    %c0_6 = arith.constant 0 : index
    %4 = vector.load %arg7[%c0_5, %c0_6] : memref<16x256xf32, #tpu.memory_space<vmem>>, vector<16x64xf32>
    tpu.vector_store %arg7[%c0_5, %c0_6], %1 {strides = array<i32>} : memref<16x256xf32, #tpu.memory_space<vmem>>, vector<16x64xf32>,
    %5 = vector.extract_strided_slice %1 {offsets = [1, 0], sizes = [15, 64], strides = [1, 1]} : vector<16x64xf32> to vector<15x64xf32>
    %c0_7 = arith.constant 0 : index
    %c64 = arith.constant 64 : index
    %6 = vector.load %arg7[%c0_7, %c64] : memref<16x256xf32, #tpu.memory_space<vmem>>, vector<15x64xf32>
    tpu.vector_store %arg7[%c0_7, %c64], %5 {strides = array<i32>} : memref<16x256xf32, #tpu.memory_space<vmem>>, vector<15x64xf32>,
    %7 = vector.extract_strided_slice %3 {offsets = [0, 0], sizes = [1, 64], strides = [1, 1]} : vector<8x64xf32> to vector<1x64xf32>
    %c15 = arith.constant 15 : index
    %c64_8 = arith.constant 64 : index
    %8 = vector.load %arg7[%c15, %c64_8] : memref<16x256xf32, #tpu.memory_space<vmem>>, vector<1x64xf32>
    tpu.vector_store %arg7[%c15, %c64_8], %7 {strides = array<i32>} : memref<16x256xf32, #tpu.memory_space<vmem>>, vector<1x64xf32>,
    %9 = vector.extract_strided_slice %1 {offsets = [2, 0], sizes = [14, 64], strides = [1, 1]} : vector<16x64xf32> to vector<14x64xf32>
    %c0_9 = arith.constant 0 : index
    %c128 = arith.constant 128 : index
    %10 = vector.load %arg7[%c0_9, %c128] : memref<16x256xf32, #tpu.memory_space<vmem>>, vector<14x64xf32>
    tpu.vector_store %arg7[%c0_9, %c128], %9 {strides = array<i32>} : memref<16x256xf32, #tpu.memory_space<vmem>>, vector<14x64xf32>,
    %11 = vector.extract_strided_slice %3 {offsets = [0, 0], sizes = [2, 64], strides = [1, 1]} : vector<8x64xf32> to vector<2x64xf32>
    %c14 = arith.constant 14 : index
    %c128_10 = arith.constant 128 : index
    %12 = vector.load %arg7[%c14, %c128_10] : memref<16x256xf32, #tpu.memory_space<vmem>>, vector<2x64xf32>
    tpu.vector_store %arg7[%c14, %c128_10], %11 {strides = array<i32>} : memref<16x256xf32, #tpu.memory_space<vmem>>, vector<2x64xf32>,
    %13 = vector.extract_strided_slice %1 {offsets = [3, 0], sizes = [13, 64], strides = [1, 1]} : vector<16x64xf32> to vector<13x64xf32>
    %c0_11 = arith.constant 0 : index
    %c192 = arith.constant 192 : index
    %14 = vector.load %arg7[%c0_11, %c192] : memref<16x256xf32, #tpu.memory_space<vmem>>, vector<13x64xf32>
    tpu.vector_store %arg7[%c0_11, %c192], %13 {strides = array<i32>} : memref<16x256xf32, #tpu.memory_space<vmem>>, vector<13x64xf32>,
    %15 = vector.extract_strided_slice %3 {offsets = [0, 0], sizes = [3, 64], strides = [1, 1]} : vector<8x64xf32> to vector<3x64xf32>
    %c13 = arith.constant 13 : index
    %c192_12 = arith.constant 192 : index
    %16 = vector.load %arg7[%c13, %c192_12] : memref<16x256xf32, #tpu.memory_space<vmem>>, vector<3x64xf32>
    tpu.vector_store %arg7[%c13, %c192_12], %15 {strides = array<i32>} : memref<16x256xf32, #tpu.memory_space<vmem>>, vector<3x64xf32>,
    %c0_13 = arith.constant 0 : index
    %c0_14 = arith.constant 0 : index
    %17 = vector.load %arg7[%c0_13, %c0_14] : memref<16x256xf32, #tpu.memory_space<vmem>>, vector<16x256xf32>
    %c0_15 = arith.constant 0 : index
    %c0_16 = arith.constant 0 : index
    %18 = vector.load %arg4[%c0_15, %c0_16] : memref<256x256xf32, #tpu.memory_space<vmem>>, vector<256x256xf32>
    %cst = arith.constant dense<0.000000e+00> : vector<16x256xf32>
    %19 = tpu.matmul %17, %18, %cst {dimension_numbers = #tpu.dot_dimension_numbers<[1], [0], [0], [1], [0, 0, 1, 1], [], []>} : vector<16x256xf32>, vector<256x256xf32>, vector<16x256xf32> -> vector<16x256xf32>
    %20 = arith.mulf %19, %19 : vector<16x256xf32>
    %cst_17 = arith.constant dense<0.000000e+00> : vector<16xf32>
    %21 = vector.multi_reduction <add>, %20, %cst_17 [1] : vector<16x256xf32> to vector<16xf32>
    %22 = vector.shape_cast %21 : vector<16xf32> to vector<16x1xf32>
    %cst_18 = arith.constant 1.290000e-07 : f32
    %23 = vector.broadcast %cst_18 : f32 to vector<16x1xf32>
    %24 = arith.addf %22, %23 : vector<16x1xf32>
    %25 = math.sqrt %24 : vector<16x1xf32>
    %26 = vector.extract_strided_slice %20 {offsets = [0, 0], sizes = [16, 128], strides = [1, 1]} : vector<16x256xf32> to vector<16x128xf32>
    %27 = vector.extract_strided_slice %20 {offsets = [0, 128], sizes = [16, 128], strides = [1, 1]} : vector<16x256xf32> to vector<16x128xf32>
    %28 = arith.addf %26, %27 : vector<16x128xf32>
    %cst_19 = arith.constant 9.99999971E-10 : f32
    %29 = vector.broadcast %cst_19 : f32 to vector<16x128xf32>
    %30 = arith.addf %28, %29 : vector<16x128xf32>
    %31 = math.sqrt %30 : vector<16x128xf32>
    %c0_20 = arith.constant 0 : index
    %c0_21 = arith.constant 0 : index
    %32 = vector.load %arg5[%c0_20, %c0_21] : memref<128x128xf32, #tpu.memory_space<vmem>>, vector<128x128xf32>
    %cst_22 = arith.constant dense<0.000000e+00> : vector<16x128xf32>
    %33 = tpu.matmul %31, %32, %cst_22 {dimension_numbers = #tpu.dot_dimension_numbers<[1], [0], [0], [1], [0, 0, 1, 1], [], []>} : vector<16x128xf32>, vector<128x128xf32>, vector<16x128xf32> -> vector<16x128xf32>
    %cst_23 = arith.constant 9.99999974E-6 : f32
    %34 = vector.broadcast %cst_23 : f32 to vector<16x128xf32>
    %35 = arith.maximumf %33, %34 : vector<16x128xf32>
    %36 = math.log %35 : vector<16x128xf32>
    %37 = tpu.iota {dimensions = array<i32: 1>} : vector<16x128xi32>
    %c127_i32 = arith.constant 127 : i32
    %38 = vector.broadcast %c127_i32 : i32 to vector<16x128xi32>
    %39 = arith.cmpi eq, %37, %38 : vector<16x128xi32>
    %40 = vector.shape_cast %25 : vector<16x1xf32> to vector<16x1xf32>
    %41 = vector.broadcast %40 : vector<16x1xf32> to vector<16x128xf32>
    %42 = arith.select %39, %41, %36 : vector<16x128xi1>, vector<16x128xf32>
    %c0_24 = arith.constant 0 : index
    %c0_25 = arith.constant 0 : index
    %c0_26 = arith.constant 0 : index
    %43 = vector.load %arg6[%c0_24, %c0_25, %c0_26] : memref<1x16x128xf32, #tpu.memory_space<vmem>>, vector<1x16x128xf32>
    %44 = vector.shape_cast %43 : vector<1x16x128xf32> to vector<16x128xf32>
    %45 = vector.shape_cast %42 : vector<16x128xf32> to vector<1x16x128xf32>
    tpu.vector_store %arg6[%c0_24, %c0_25, %c0_26], %45 {strides = array<i32>} : memref<1x16x128xf32, #tpu.memory_space<vmem>>, vector<1x16x128xf32>,
    return
  }
  func.func @transform_0(%arg0: i32, %arg1: i32) -> (i32, i32, i32) {
    %c0_i32 = arith.constant 0 : i32
    %c0_i32_0 = arith.constant 0 : i32
    return %arg0, %arg1, %c0_i32 : i32, i32, i32
  }
  func.func @transform_1(%arg0: i32, %arg1: i32) -> (i32, i32, i32) {
    %c1_i32 = arith.constant 1 : i32
    %0 = arith.addi %arg1, %c1_i32 : i32
    %c2_i32 = arith.constant 2 : i32
    %1 = arith.muli %0, %c2_i32 : i32
    %c0_i32 = arith.constant 0 : i32
    %c0_i32_0 = arith.constant 0 : i32
    return %arg0, %1, %c0_i32 : i32, i32, i32
  }
  func.func @transform_2(%arg0: i32, %arg1: i32) -> (i32, i32) {
    %c0_i32 = arith.constant 0 : i32
    %c0_i32_0 = arith.constant 0 : i32
    %c0_i32_1 = arith.constant 0 : i32
    return %c0_i32, %c0_i32_0 : i32, i32
  }
  func.func @transform_3(%arg0: i32, %arg1: i32) -> (i32, i32) {
    %c0_i32 = arith.constant 0 : i32
    %c0_i32_0 = arith.constant 0 : i32
    %c0_i32_1 = arith.constant 0 : i32
    return %c0_i32, %c0_i32_0 : i32, i32
  }
  func.func @transform_4(%arg0: i32, %arg1: i32) -> (i32, i32, i32) {
    %c0_i32 = arith.constant 0 : i32
    %c0_i32_0 = arith.constant 0 : i32
    return %arg0, %arg1, %c0_i32 : i32, i32, i32
  }
}

</mosaic_0001>

<bundles_post_ra>
// kernel: tpu_custom_call.1
= control target key start
LH: loop header
LB: loop body
LE: loop exit
PB: predicated region body
PF: predicated region fallthrough
CT: control target
= control target key end

     0   :  { %s1484_s0 = inlined_call_operand.hbm [shape: f32[2,24,64], index: 0, kind: input, shape index: {}]   ;;  %s1485_s1 = inlined_call_operand.hbm [shape: f32[2,24,64], index: 1, kind: input, shape index: {}]   ;;  %s1486_s2 = inlined_call_operand.hbm [shape: f32[256,256], index: 2, kind: input, shape index: {}]   ;;  %s1487_s3 = inlined_call_operand.hbm [shape: f32[128,128], index: 3, kind: input, shape index: {}]   ;;  %s1488_s4 = inlined_call_operand.hbm [shape: f32[2,16,128], index: 4, kind: output, shape index: {}]  }
   0x1   :  { %1494 = sst [smem:[#allocation21_spill]] %s1484_s0 }
   0x2   :  { %1495 = sst [smem:[#allocation22_spill]] %s1486_s2 }
   0x3   :  { %1496 = sst [smem:[#allocation23_spill]] %s1487_s3 }
   0x4   :  { %9 = vsyncpa [#allocation4], 0 }
   0x5   :  { %11 = vsyncpa [#allocation4 + $0x1], 0 }
   0x6   :  { %12 = vsyncpa [#allocation7], 0 }
   0x7   :  { %14 = vsyncpa [#allocation7 + $0x1], 0 }
   0x8   :  { %15 = vsyncpa [#allocation10], 0 }
   0x9   :  { %16 = vsyncpa [#allocation5], 0 }
   0xa   :  { %18 = vsyncpa [#allocation5 + $0x1], 0  ;;  %s1247_s15 = smov 0   ;;  %s1249_s16 = smov 0  }
   0xb   :  { %s1251_s17 = smov 0   ;;  %s1253_s18 = smov 0  }
   0xc   :  { %s1255_s19 = smov 0   ;;  %s1257_s20 = smov 0  }
   0xd LB: > { %1497 = sst [smem:[#allocation17_spill]] %s1196_s17  ;;  %s1278_s21 = sadd.s32 4294967295, %s1208_s20   ;;  %s1208_s20 = sphi %s1257_s20, %s24_s20   ;;  %s1204_s19 = sphi %s1255_s19, %s1521_s19   ;;  %s1200_s18 = sphi %s1253_s18, %s1520_s18   ;;  %s1196_s17 = sphi %s1251_s17, %s1519_s17   ;;  %s1192_s16 = sphi %s1249_s16, %s1523_s16   ;;  %s1188_s15 = sphi %s1247_s15, %s1522_s15  }
   0xe   : > { %1498 = sst [smem:[#allocation18_spill]] %s1204_s19  ;;  %s825_s22 = sadd.s32 4294967294, %s1208_s20  }
   0xf   : > { %p58_p0 = scmp.ne.s32.totalorder %s1192_s16, %s1188_s15  ;;  %p1489_p1 = scmp.eq.s32.totalorder %s1278_s21, 0 }
  0x10   : > { %p164_p3 = scmp.eq.s32.totalorder %s825_s22, 1  ;;  %p826_p5 = scmp.ge.s32.totalorder %s1208_s20, 1 }
  0x11   : > { %p1287_p4 = por %p1489_p1, %p58_p0  ;;  %p171_p7 = scmp.lt.s32.totalorder %s1208_s20, 3 }
  0x12   : > { %p1292_p6 = por %p164_p3, %p58_p0  ;;  %s1210_s26 = smov [#allocation8]  }
  0x13   : > { %p1297_p8 = pnand %p826_p5, %p171_p7  ;;  %s183_s27 = sshll.u32 %s1210_s26, 4  ;;  %s184_s27 = int_to_ptr.vmem [resolvable:$true] %s183_s27 }
  0x14   : > { %s1500_s24 = scalar_select %p1292_p6, 1, 0 }
  0x15   : > { %p914_p9 = pneg %p1297_p8  ;;  %s1211_s29 = smov [#allocation9]  }
  0x16   : > { %s196_s30 = sshll.u32 %s1211_s29, 4  ;;  %s1018_s5 = scalar_lea.vmem %s184_s27, 8192  ;;  %s197_s30 = int_to_ptr.vmem [resolvable:$true] %s196_s30 }
  0x17   : > { %p1306_p11 = pnand %p914_p9, %p1489_p1  ;;  %p1019_p13 = scmp.ne.s32.totalorder %s184_s27, %s1018_s5 }
  0x18   : > { %p1026_p5 = scmp.lt.s32.totalorder %s184_s27, %s184_s27  ;;  %p1027_p7 = scmp.lt.s32.totalorder %s1018_s5, %s1018_s5 }
  0x19   : > { %p1009_p12 = pneg %p1306_p11 }
  0x1a   : > { %p1028_p10 = por %p1027_p7, %p1026_p5 }
  0x1b   : > { %p1021_p0 = pnand %p1019_p13, %p1009_p12 }
  0x1d   : > { %p1022_p3 = pneg %p1021_p0 }
  0x1f   : > { %p1029_p9 = pnand %p1028_p10, %p1022_p3 }
  0x21   : > { %1032 = shalt.err (!%p1029_p9)
}
  0x22   : > { %s1212_s6 = smov 256   ;;  %s1213_s7 = smov 16  }
  0x23   : > { %s1503_s2 = sld [smem:[#allocation22_spill]]  ;;  %s1044_s10 = scalar_lea.vmem %s197_s30, 2048 }
  0x24   : > { %p1045_p1 = scmp.ne.s32.totalorder %s197_s30, %s1044_s10  ;;  %p1052_p2 = scmp.lt.s32.totalorder %s197_s30, %s197_s30 }
  0x25   : > { %p1053_p6 = scmp.lt.s32.totalorder %s1044_s10, %s1044_s10 }
  0x26   : > { %p1047_p13 = pnand %p1045_p1, %p1009_p12 }
  0x27   : > { %p1054_p5 = por %p1053_p6, %p1052_p2 }
  0x28   : > { %p1048_p0 = pneg %p1047_p13 }
  0x29   : > { %917 = dma.hbm_to_vmem [thread:$0]  (!%p1306_p11), %s1503_s2, 8192, %s184_s27, [#allocation7], %s1212_s6, %s1212_s6, %s1213_s7  }
  0x2a   : > { %p1055_p10 = pnand %p1054_p5, %p1048_p0 }
  0x2c   : > { %1058 = shalt.err (!%p1055_p10)
}
  0x2d   : > { %s1490_s11 = smov 128   ;;  %s1215_s12 = smov 8  }
  0x2e   : > { %s1504_s3 = sld [smem:[#allocation23_spill]]  ;;  %s36_s22 = sadd.s32 1, %s1204_s19 }
  0x2f   : > { %s45_s26 = sadd.s32 1, %s1196_s17  ;;  %p38_p1 = scmp.ge.s32.totalorder %s36_s22, 2 }
  0x30   : > { %p52_p2 = scmp.ne.s32.totalorder %s1196_s17, %s1192_s16  ;;  %p53_p6 = scmp.eq.s32.totalorder %s1208_s20, 0 }
  0x31   : > { %p934_p12 = scmp.lt.s32.totalorder %s1208_s20, 2  ;;  %s1525_s22 = smov (%p38_p1, %s36_s22), 0 }
  0x32   : > { %1505 = sst [smem:[#allocation19_spill]] %s1525_s22  ;;  %p54_p3 = por %p53_p6, %p52_p2 }
  0x33   : > { %p1506_p7 = scmp.eq.s32.totalorder %s1278_s21, 1  ;;  %s40_s28 = ssub.s32 %s1204_s19, %s1525_s22 }
  0x34   : > { %920 = dma.hbm_to_vmem [thread:$0]  (!%p1306_p11), %s1504_s3, 2048, %s197_s30, [#allocation10], %s1490_s11, %s1490_s11, %s1215_s12  }
  0x35   : > { %p1341_p9 = por %p1506_p7, %p52_p2  ;;  %s1348_s29 = sand.u32 1, %s1196_s17  }
  0x36   : > { %p43_p11 = scmp.eq.s32.totalorder %s40_s28, 0  ;;  %s830_s30 = sshll.u32 %s1348_s29, 4 }
  0x37   : > { %s899_s5 = smul.u32 384, %s1204_s19  ;;  %s1509_s0 = sld [smem:[#allocation21_spill]] }
  0x38   : > { %s1353_s6 = scalar_select %p43_p11, %s1196_s17, %s45_s26  }
  0x39   : > { %s214_s10 = scalar_lea.vmem [#allocation3], %s830_s30  ;;  %p1360_p13 = pnand %p934_p12, %p54_p3 }
  0x3a   : > { %1508 = sst [smem:[#allocation20_spill]] %s1353_s6  ;;  %s229_s13 = sshll.u32 %s214_s10, 4  ;;  %s230_s13 = int_to_ptr.vmem [resolvable:$true] %s229_s13 }
  0x3b   : > { %s239_s11 = sand.u32 1, %s1208_s20   ;;  %s211_s28 = scalar_lea.sflag [#allocation4], %s1348_s29 }
  0x3c   : > { %p1061_p0 = pneg %p1360_p13  ;;  %s1072_s26 = scalar_lea.vmem %s230_s13, 256 }
  0x3d   : > { %s227_s9 = scalar_lea.hbm %s1509_s0, %s899_s5  ;;  %p1073_p5 = scmp.ne.s32.totalorder %s230_s13, %s1072_s26 }
  0x3e   : > { %s1216_s30 = smov [#allocation3]  }
  0x3f   : > { %p1075_p10 = pnand %p1073_p5, %p1061_p0  ;;  %s1077_s7 = sshll.u32 %s1216_s30, 4  ;;  %s1078_s7 = int_to_ptr.vmem [resolvable:$false] %s1077_s7 }
  0x40   : > { %s1079_s8 = scalar_lea.vmem %s1078_s7, 512  ;;  %p1080_p2 = scmp.lt.s32.totalorder %s230_s13, %s1078_s7 }
  0x41   : > { %p1076_p1 = pneg %p1075_p10  ;;  %p1081_p6 = scmp.lt.s32.totalorder %s1079_s8, %s1072_s26 }
  0x43   : > { %p1082_p12 = por %p1081_p6, %p1080_p2 }
  0x45   : > { %p1083_p3 = pnand %p1082_p12, %p1076_p1 }
  0x47   : > { %1086 = shalt.err (!%p1083_p3)
}
  0x48   : > { %s1511_s10 = smov 128   ;;  %s832_s0 = sshll.u32 %s1348_s29, 3 }
  0x49   : > { %924 = dma.hbm_to_vmem [thread:$0]  (!%p1360_p13), %s227_s9, 256, %s230_s13, %s211_s28, %s1511_s10, %s1511_s10, %s1215_s12  }
  0x4a   : > { %s737_s30 = scalar_lea.hbm %s1485_s1, %s899_s5  ;;  %s243_s19 = scalar_lea.vmem [#allocation6], %s832_s0 }
  0x4b   : > { %s738_s22 = scalar_lea.hbm %s737_s30, 256  ;;  %s254_s7 = sshll.u32 %s243_s19, 4  ;;  %s255_s7 = int_to_ptr.vmem [resolvable:$true] %s254_s7 }
  0x4c   : > { %s240_s26 = scalar_lea.sflag [#allocation7], %s239_s11  ;;  %s1100_s8 = scalar_lea.vmem %s255_s7, 128 }
  0x4d   : > { %p1101_p7 = scmp.ne.s32.totalorder %s255_s7, %s1100_s8  ;;  %s1217_s6 = smov [#allocation6]  }
  0x4e   : > { %s1105_s17 = sshll.u32 %s1217_s6, 4  ;;  %s1106_s17 = int_to_ptr.vmem [resolvable:$false] %s1105_s17 }
  0x4f   : > { %p1103_p11 = pnand %p1101_p7, %p1061_p0  ;;  %s1107_s12 = scalar_lea.vmem %s1106_s17, 256 }
  0x50   : > { %p1108_p10 = scmp.lt.s32.totalorder %s255_s7, %s1106_s17  ;;  %p1109_p1 = scmp.lt.s32.totalorder %s1107_s12, %s1100_s8 }
  0x51   : > { %p1104_p5 = pneg %p1103_p11 }
  0x52   : > { %p1110_p2 = por %p1109_p1, %p1108_p10 }
  0x54   : > { %p1111_p6 = pnand %p1110_p2, %p1104_p5 }
  0x56   : > { %1114 = shalt.err (!%p1111_p6)
}
  0x57   : > { %927 = dma.hbm_to_vmem [thread:$0]  (!%p1360_p13), %s738_s22, 128, %s255_s7, %s240_s26  }
  0x58   : > { %263 = sbr.rel (%p1297_p8) target bundleno = 687 (0x2af), region = 36  ;;  %s1388_s0 = sand.u32 (!%p1297_p8), 1, %s1192_s16  }
  0x59   : > { %s835_s2 = sshll.u32 (!%p1297_p8), %s1388_s0, 4  ;;  %s266_s3 = scalar_lea.sflag (!%p1297_p8), [#allocation4], %s1388_s0 }
  0x5a   : > { %s269_s17 = scalar_lea.vmem (!%p1297_p8), [#allocation3], %s835_s2 }
  0x5d   : > { %1167 = dma.done.wait (%p1287_p4), %s266_s3, 256  }
  0x5e   : > { %1169 = vsyncadd (%p1287_p4), %s266_s3, 4294967040  ;;  %s274_s19 = sand.u32 1, %s1278_s21   ;;  %s836_s25 = sshll.u32 %s1388_s0, 3 }
  0x5f   : > { %s275_s11 = scalar_lea.sflag [#allocation7], %s274_s19  ;;  %s278_s22 = scalar_lea.vmem [#allocation6], %s836_s25 }
  0x60   : > { %1171 = dma.done.wait (%p1287_p4), %s275_s11, 128  }
  0x61   : > { %1173 = vsyncadd (%p1287_p4), %s275_s11, 4294967168  ;;  %p1512_p8 = scmp.eq.s32.totalorder %s1278_s21, 0 }
  0x63   : > { %1175 = dma.done.wait (%p1512_p8), [#allocation7], 8192   ;;  %p1513_p13 = pmov %p1512_p8 }
  0x64   : > { %p1514_p0 = pmov %p1512_p8 }
  0x65   : > { %1177 = vsyncadd (%p1513_p13), [#allocation7], 4294959104 }
  0x66   : > { %1179 = dma.done.wait (%p1514_p0), [#allocation10], 2048   ;;  %p1515_p12 = pmov %p1514_p0 }
  0x67   : > { %vm365_vm0 = vcmask 1044480   ;;  %vm359_vm1 = vcmask 521216   ;;  %v325_v0 = vld [vmem:[%s269_s17 + $0x8] sm:$0xff]  ;;  %v324_v1 = vld [vmem:[%s269_s17] sm:$0xff]  ;;  %vm327_vm2 = vcmask 523264   ;;  %vm352_vm3 = vcmask 1045504  }
  0x68   : > { %1181 = vsyncadd (%p1515_p12), [#allocation10], 4294965248  ;;  %v326_v2 = vld [vmem:[%s278_s22] sm:$0xff]  ;;  %vm363_vm4 = vcmask 523270   ;;  %v367_v3 = vrot.slane %v325_v0, 3  ;;  %v354_v4 = vrot.slane %v325_v0, 2 }
  0x69   : > { %v366_v5 = vrot.slane %v324_v1, 3  ;;  %v353_v6 = vrot.slane %v324_v1, 2  ;;  %v419_v7 = vld [vmem:[#allocation8 + $0xf8] sm:$0xff]  ;;  %v418_v8 = vld [vmem:[#allocation8 + $0xf0] sm:$0xff]  ;;  %328 = vst.msk [vmem:[#allocation2] sm:$0xff] %vm327_vm2, %v324_v1  ;;  %329 = vst.msk [vmem:[#allocation2 + $0x10] sm:$0xff] %vm327_vm2, %v325_v0 }
  0x6a   : > { %v361_v9 = vrot.slane %v326_v2, 2  ;;  %vm332_vm5 = vcmask 1046528   ;;  %v333_v10 = vrot.slane %v324_v1, 1  ;;  %v334_v11 = vrot.slane %v325_v0, 1  ;;  %452 = vmatprep.subr.mxu0 %v419_v7  ;;  %v417_v12 = vld [vmem:[#allocation8 + $0xe8] sm:$0xff]  ;;  %v416_v13 = vld [vmem:[#allocation8 + $0xe0] sm:$0xff] }
  0x6b   : > { %s1218_s21 = smov 64   ;;  %v368_v14 = vsel %vm365_vm0, %v366_v5, %v367_v3  ;;  %v378_v15 = vrot.slane %v326_v2, 3  ;;  %453 = vmatpush1.msra.mxu0 %v418_v8  ;;  %v415_v16 = vld [vmem:[#allocation8 + $0xd8] sm:$0xff]  ;;  %360 = vst.msk [vmem:[#allocation2 + $0x18] sm:$0x3f] %vm359_vm1, %v354_v4  ;;  %v355_v17 = vsel %vm352_vm3, %v353_v6, %v354_v4  ;;  %v414_v18 = vld [vmem:[#allocation8 + $0xd0] sm:$0xff] }
  0x6c   : > { %371 = vrot.lane.b32.xlu1 %v367_v3, %s1218_s21  ;;  %369 = vrot.lane.b32.xlu0 %v368_v14, %s1218_s21  ;;  %358 = vst.msk [vmem:[#allocation2 + $0x8] sm:$0xff] %vm327_vm2, %v355_v17  ;;  %v335_v19 = vsel %vm332_vm5, %v333_v10, %v334_v11  ;;  %v413_v20 = vld [vmem:[#allocation8 + $0xc8] sm:$0xff]  ;;  %v412_v21 = vld [vmem:[#allocation8 + $0xc0] sm:$0xff]  ;;  %v411_v22 = vld [vmem:[#allocation8 + $0xb8] sm:$0xff]  ;;  %vm376_vm6 = vcmask 1044992   ;;  %vm342_vm7 = vcmask 1048064  }
  0x6d   : > { %454 = vmatprep.subr.mxu0 %v417_v12  ;;  %364 = vst.msk [vmem:[#allocation2 + $0x18] sm:$0xc0] %vm363_vm4, %v361_v9  ;;  %v410_v23 = vld [vmem:[#allocation8 + $0xb0] sm:$0xff]  ;;  %v409_v24 = vld [vmem:[#allocation8 + $0xa8] sm:$0xff]  ;;  %v408_v25 = vld [vmem:[#allocation8 + $0xa0] sm:$0xff]  ;;  %vm382_vm8 = vcmask 1048069  }
  0x6e   : > { %455 = vmatpush1.msra.mxu0 %v416_v13  ;;  %v407_v26 = vld [vmem:[#allocation8 + $0x98] sm:$0xff]  ;;  %v406_v27 = vld [vmem:[#allocation8 + $0x90] sm:$0xff]  ;;  %v405_v28 = vld [vmem:[#allocation8 + $0x88] sm:$0xff]  ;;  %vm350_vm9 = vcmask 1040896   ;;  %vm344_vm10 = vcmask 1047040   ;;  %s845_s23 = sshll.u32 %s1200_s18, 8 }
  0x6f   : > { %456 = vmatprep.subr.mxu0 %v415_v16  ;;  %v404_v29 = vld [vmem:[#allocation8 + $0x80] sm:$0xff]  ;;  %v403_v30 = vld [vmem:[#allocation8 + $0x78] sm:$0xff]  ;;  %v402_v31 = vld [vmem:[#allocation8 + $0x70] sm:$0xff]  ;;  %s315_s29 = scalar_lea.vmem [#allocation11], %s835_s2  ;;  %s1433_s13 = scalar_lea.hbm %s1488_s4, %s845_s23 }
  0x70   : > { %379 = vrot.lane.b32.xlu1 %v378_v15, %s1218_s21  ;;  %457 = vmatpush1.msra.mxu0 %v414_v18  ;;  %v401_v32 = vld [vmem:[#allocation8 + $0x68] sm:$0xff]  ;;  %v400_v33 = vld [vmem:[#allocation8 + $0x60] sm:$0xff]  ;;  %v399_v34 = vld [vmem:[#allocation8 + $0x58] sm:$0xff]  ;;  %s691_s5 = sshll.u32 %s315_s29, 4  ;;  %s676_s18 = scalar_lea.sflag [#allocation5], %s1388_s0  ;;  %s1435_s5 = int_to_ptr.vmem [resolvable:$true] %s691_s5 }
  0x71   : > { %336 = vrot.lane.b32.xlu0 %v335_v19, %s1218_s21  ;;  %458 = vmatprep.subr.mxu0 %v413_v20  ;;  %v398_v35 = vld [vmem:[#allocation8 + $0x50] sm:$0xff]  ;;  %v397_v36 = vld [vmem:[#allocation8 + $0x48] sm:$0xff]  ;;  %v396_v37 = vld [vmem:[#allocation8 + $0x40] sm:$0xff]  ;;  %s1116_s14 = scalar_lea.vmem %s1435_s5, 256  ;;  %s1219_s28 = smov [#allocation11]  }
  0x72   : > { %459 = vmatpush1.msra.mxu0 %v412_v21  ;;  %v395_v38 = vld [vmem:[#allocation8 + $0x38] sm:$0xff]  ;;  %v394_v40 = vld [vmem:[#allocation8 + $0x30] sm:$0xff]  ;;  %v393_v41 = vld [vmem:[#allocation8 + $0x28] sm:$0xff]  ;;  %p1117_p4 = scmp.ne.s32.totalorder %s1435_s5, %s1116_s14  ;;  %s1120_s10 = sshll.u32 %s1219_s28, 4  ;;  %s1121_s10 = int_to_ptr.vmem [resolvable:$false] %s1120_s10 }
  0x73   : > { %460 = vmatprep.subr.mxu0 %v411_v22  ;;  %v586_v39 = vld [vmem:[#allocation9 + $0x78] sm:$0xff]  ;;  %v392_v42 = vld [vmem:[#allocation8 + $0x20] sm:$0xff]  ;;  %v390_v44 = vld [vmem:[#allocation8 + $0x10] sm:$0xff]  ;;  %s1122_s30 = scalar_lea.vmem %s1121_s10, 512  ;;  %p1123_p11 = scmp.lt.s32.totalorder %s1435_s5, %s1121_s10 }
  0x74   : > { %347 = vrot.lane.b32.xlu1 %v326_v2, %s1218_s21  ;;  %461 = vmatpush1.msra.mxu0 %v410_v23  ;;  %v391_v43 = vld [vmem:[#allocation8 + $0x18] sm:$0xff]  ;;  %v389_v45 = vld [vmem:[#allocation8 + $0x8] sm:$0xff]  ;;  %v388_v46 = vld [vmem:[#allocation8] sm:$0xff]  ;;  %p1118_p3 = pnand %p1117_p4, %p1341_p9  ;;  %p1124_p5 = scmp.lt.s32.totalorder %s1122_s30, %s1116_s14 }
  0x75   : > { %338 = vrot.lane.b32.xlu0 %v334_v11, %s1218_s21  ;;  %462 = vmatprep.subr.mxu0 %v409_v24  ;;  %v451_v47 = vld [vmem:[#allocation8 + $0x1f8] sm:$0xff]  ;;  %v450_v48 = vld [vmem:[#allocation8 + $0x1f0] sm:$0xff]  ;;  %v449_v49 = vld [vmem:[#allocation8 + $0x1e8] sm:$0xff] }
  0x76   : > { %463 = vmatpush1.msra.mxu0 %v408_v25  ;;  %864 = vmatprep.subr.mxu1 %v586_v39  ;;  %v448_v50 = vld [vmem:[#allocation8 + $0x1e0] sm:$0xff]  ;;  %v447_v51 = vld [vmem:[#allocation8 + $0x1d8] sm:$0xff]  ;;  %v446_v52 = vld [vmem:[#allocation8 + $0x1d0] sm:$0xff]  ;;  %p1119_p7 = pneg %p1118_p3  ;;  %p1125_p10 = por %p1124_p5, %p1123_p11 }
  0x77   : > { %464 = vmatprep.subr.mxu0 %v407_v26  ;;  %865 = vmatpush3.msra.mxu1 %v586_v39  ;;  %v445_v53 = vld [vmem:[#allocation8 + $0x1c8] sm:$0xff]  ;;  %v444_v54 = vld [vmem:[#allocation8 + $0x1c0] sm:$0xff]  ;;  %v443_v55 = vld [vmem:[#allocation8 + $0x1b8] sm:$0xff] }
  0x78   : > { %465 = vmatpush1.msra.mxu0 %v406_v27  ;;  %v442_v56 = vld [vmem:[#allocation8 + $0x1b0] sm:$0xff]  ;;  %v441_v57 = vld [vmem:[#allocation8 + $0x1a8] sm:$0xff]  ;;  %v440_v58 = vld [vmem:[#allocation8 + $0x1a0] sm:$0xff]  ;;  %p1126_p1 = pnand %p1125_p10, %p1119_p7 }
  0x79   : > { %466 = vmatprep.subr.mxu0 %v405_v28  ;;  %v439_v59 = vld [vmem:[#allocation8 + $0x198] sm:$0xff]  ;;  %v438_v60 = vld [vmem:[#allocation8 + $0x190] sm:$0xff]  ;;  %v437_v61 = vld [vmem:[#allocation8 + $0x188] sm:$0xff] }
  0x7a   : > { %467 = vmatpush1.msra.mxu0 %v404_v29  ;;  %v436_v62 = vld [vmem:[#allocation8 + $0x180] sm:$0xff]  ;;  %v435_v63 = vld [vmem:[#allocation8 + $0x178] sm:$0xff]  ;;  %v434_v0 = vld [vmem:[#allocation8 + $0x170] sm:$0xff] }
  0x7b   : > { %468 = vmatprep.subr.mxu0 %v403_v30  ;;  %v433_v1 = vld [vmem:[#allocation8 + $0x168] sm:$0xff]  ;;  %v432_v2 = vld [vmem:[#allocation8 + $0x160] sm:$0xff]  ;;  %v431_v3 = vld [vmem:[#allocation8 + $0x158] sm:$0xff] }
  0x7c   : > { %469 = vmatpush1.msra.mxu0 %v402_v31  ;;  %v430_v4 = vld [vmem:[#allocation8 + $0x150] sm:$0xff]  ;;  %v429_v5 = vld [vmem:[#allocation8 + $0x148] sm:$0xff]  ;;  %v428_v6 = vld [vmem:[#allocation8 + $0x140] sm:$0xff] }
  0x7d   : > { %470 = vmatprep.subr.mxu0 %v401_v32  ;;  %v427_v7 = vld [vmem:[#allocation8 + $0x138] sm:$0xff]  ;;  %v426_v8 = vld [vmem:[#allocation8 + $0x130] sm:$0xff]  ;;  %v425_v9 = vld [vmem:[#allocation8 + $0x128] sm:$0xff] }
  0x7e   : > { %471 = vmatpush1.msra.mxu0 %v400_v33  ;;  %v424_v10 = vld [vmem:[#allocation8 + $0x120] sm:$0xff]  ;;  %v423_v11 = vld [vmem:[#allocation8 + $0x118] sm:$0xff]  ;;  %v422_v12 = vld [vmem:[#allocation8 + $0x110] sm:$0xff] }
  0x7f   : > { %472 = vmatprep.subr.mxu0 %v399_v34  ;;  %v421_v13 = vld [vmem:[#allocation8 + $0x108] sm:$0xff]  ;;  %v420_v14 = vld [vmem:[#allocation8 + $0x100] sm:$0xff]  ;;  %v585_v25 = vld [vmem:[#allocation9 + $0x70] sm:$0xff] }
  0x80   : > { %473 = vmatpush1.msra.mxu0 %v398_v35  ;;  %866 = vmatprep.subr.mxu1 %v585_v25  ;;  %v584_v26 = vld [vmem:[#allocation9 + $0x68] sm:$0xff]  ;;  %v583_v27 = vld [vmem:[#allocation9 + $0x60] sm:$0xff]  ;;  %v582_v28 = vld [vmem:[#allocation9 + $0x58] sm:$0xff] }
  0x81   : > { %474 = vmatprep.subr.mxu0 %v397_v36  ;;  %867 = vmatpush3.msra.mxu1 %v585_v25  ;;  %v581_v29 = vld [vmem:[#allocation9 + $0x50] sm:$0xff]  ;;  %v580_v30 = vld [vmem:[#allocation9 + $0x48] sm:$0xff]  ;;  %v579_v31 = vld [vmem:[#allocation9 + $0x40] sm:$0xff] }
  0x82   : > { %475 = vmatpush1.msra.mxu0 %v396_v37  ;;  %868 = vmatprep.subr.mxu1 %v584_v26  ;;  %v578_v32 = vld [vmem:[#allocation9 + $0x38] sm:$0xff]  ;;  %v577_v33 = vld [vmem:[#allocation9 + $0x30] sm:$0xff]  ;;  %v576_v34 = vld [vmem:[#allocation9 + $0x28] sm:$0xff] }
  0x83   : > { %476 = vmatprep.subr.mxu0 %v395_v38  ;;  %869 = vmatpush3.msra.mxu1 %v584_v26  ;;  %v575_v35 = vld [vmem:[#allocation9 + $0x20] sm:$0xff]  ;;  %v574_v36 = vld [vmem:[#allocation9 + $0x18] sm:$0xff]  ;;  %v573_v37 = vld [vmem:[#allocation9 + $0x10] sm:$0xff] }
  0x84   : > { %477 = vmatpush1.msra.mxu0 %v394_v40  ;;  %870 = vmatprep.subr.mxu1 %v583_v27  ;;  %v572_v38 = vld [vmem:[#allocation9 + $0x8] sm:$0xff]  ;;  %v571_v39 = vld [vmem:[#allocation9] sm:$0xff] }
  0x85   : > { %478 = vmatprep.subr.mxu0 %v393_v41  ;;  %871 = vmatpush3.msra.mxu1 %v583_v27 }
  0x86   : > { %479 = vmatpush1.msra.mxu0 %v392_v42  ;;  %872 = vmatprep.subr.mxu1 %v582_v28 }
  0x87   : > { %480 = vmatprep.subr.mxu0 %v391_v43  ;;  %873 = vmatpush3.msra.mxu1 %v582_v28 }
  0x88   : > { %481 = vmatpush1.msra.mxu0 %v390_v44  ;;  %874 = vmatprep.subr.mxu1 %v581_v29 }
  0x89   : > { %482 = vmatprep.subr.mxu0 %v389_v45  ;;  %875 = vmatpush3.msra.mxu1 %v581_v29 }
  0x8a   : > { %483 = vmatpush1.msra.mxu0 %v388_v46  ;;  %876 = vmatprep.subr.mxu1 %v580_v30 }
  0x8b   : > { %484 = vmatprep.subr.mxu0 %v451_v47  ;;  %877 = vmatpush3.msra.mxu1 %v580_v30 }
  0x8c   : > { %485 = vmatpush2.msra.mxu0 %v450_v48  ;;  %878 = vmatprep.subr.mxu1 %v579_v31 }
  0x8d   : > { %486 = vmatprep.subr.mxu0 %v449_v49  ;;  %879 = vmatpush3.msra.mxu1 %v579_v31 }
  0x8e   : > { %487 = vmatpush2.msra.mxu0 %v448_v50  ;;  %880 = vmatprep.subr.mxu1 %v578_v32 }
  0x8f   : > { %488 = vmatprep.subr.mxu0 %v447_v51  ;;  %881 = vmatpush3.msra.mxu1 %v578_v32 }
  0x90   : > { %489 = vmatpush2.msra.mxu0 %v446_v52  ;;  %882 = vmatprep.subr.mxu1 %v577_v33 }
  0x91   : > { %490 = vmatprep.subr.mxu0 %v445_v53  ;;  %883 = vmatpush3.msra.mxu1 %v577_v33 }
  0x92   : > { %491 = vmatpush2.msra.mxu0 %v444_v54  ;;  %884 = vmatprep.subr.mxu1 %v576_v34 }
  0x93   : > { %492 = vmatprep.subr.mxu0 %v443_v55  ;;  %885 = vmatpush3.msra.mxu1 %v576_v34 }
  0x94   : > { %493 = vmatpush2.msra.mxu0 %v442_v56  ;;  %886 = vmatprep.subr.mxu1 %v575_v35 }
  0x95   : > { %494 = vmatprep.subr.mxu0 %v441_v57  ;;  %887 = vmatpush3.msra.mxu1 %v575_v35 }
  0x96   : > { %495 = vmatpush2.msra.mxu0 %v440_v58  ;;  %888 = vmatprep.subr.mxu1 %v574_v36 }
  0x97   : > { %496 = vmatprep.subr.mxu0 %v439_v59  ;;  %889 = vmatpush3.msra.mxu1 %v574_v36 }
  0x98   : > { %497 = vmatpush2.msra.mxu0 %v438_v60  ;;  %890 = vmatprep.subr.mxu1 %v573_v37 }
  0x99   : > { %498 = vmatprep.subr.mxu0 %v437_v61  ;;  %891 = vmatpush3.msra.mxu1 %v573_v37 }
  0x9a   : > { %499 = vmatpush2.msra.mxu0 %v436_v62  ;;  %892 = vmatprep.subr.mxu1 %v572_v38 }
  0x9b   : > { %500 = vmatprep.subr.mxu0 %v435_v63  ;;  %893 = vmatpush3.msra.mxu1 %v572_v38 }
  0x9c   : > { %501 = vmatpush2.msra.mxu0 %v434_v0  ;;  %894 = vmatprep.subr.mxu1 %v571_v39 }
  0x9d   : > { %502 = vmatprep.subr.mxu0 %v433_v1  ;;  %895 = vmatpush3.msra.mxu1 %v571_v39 }
  0x9e   : > { %503 = vmatpush2.msra.mxu0 %v432_v2 }
  0x9f   : > { %504 = vmatprep.subr.mxu0 %v431_v3 }
  0xa0   : > { %505 = vmatpush2.msra.mxu0 %v430_v4 }
  0xa1   : > { %506 = vmatprep.subr.mxu0 %v429_v5 }
  0xa2   : > { %507 = vmatpush2.msra.mxu0 %v428_v6 }
  0xa3   : > { %508 = vmatprep.subr.mxu0 %v427_v7  ;;  %v668_v7 = vlaneseq }
  0xa4   : > { %509 = vmatpush2.msra.mxu0 %v426_v8 }
  0xa5   : > { %510 = vmatprep.subr.mxu0 %v425_v9 }
  0xa6   : > { %511 = vmatpush2.msra.mxu0 %v424_v10  ;;  %v669_v10 = vand.u32 127, %v668_v7 }
  0xa7   : > { %512 = vmatprep.subr.mxu0 %v423_v11 }
  0xa8   : > { %513 = vmatpush2.msra.mxu0 %v422_v12  ;;  %vm670_vm0 = vcmp.eq.s32.totalorder %v669_v10, 127 }
  0xa9   : > { %514 = vmatprep.subr.mxu0 %v421_v13 }
  0xaa   : > { %515 = vmatpush2.msra.mxu0 %v420_v14 }
  0xde   : > { %v372_v15 = vpop.permute.xlu1 %371  ;;  %v370_v16 = vpop.permute.xlu0 %369 }
  0xdf   : > { %377 = vst.msk [vmem:[#allocation2 + $0x18] sm:$0x1f] %vm376_vm6, %v372_v15 }
  0xe0   : > { %375 = vst.msk [vmem:[#allocation2 + $0x8] sm:$0xff] %vm342_vm7, %v370_v16 }
  0xe2   : > { %v380_v17 = vpop.permute.xlu1 %379 }
  0xe3   : > { %383 = vst.msk [vmem:[#allocation2 + $0x18] sm:$0xe0] %vm382_vm8, %v380_v17  ;;  %v337_v18 = vpop.permute.xlu0 %336 }
  0xe4   : > { %343 = vst.msk [vmem:[#allocation2] sm:$0xff] %vm342_vm7, %v337_v18 }
  0xe6   : > { %v348_v19 = vpop.permute.xlu1 %347 }
  0xe7   : > { %351 = vst.msk [vmem:[#allocation2 + $0x17] sm:$0x1] %vm350_vm9, %v348_v19  ;;  %v339_v20 = vpop.permute.xlu0 %338  ;;  %v385_v21 = vld [vmem:[#allocation2 + $0x8] sm:$0xff] }
  0xe8   : > { %345 = vst.msk [vmem:[#allocation2 + $0x10] sm:$0x7f] %vm344_vm10, %v339_v20  ;;  %516 = vmatprep.mubr.f32.mxu0 %v385_v21 }
  0xea   : > { %v387_v23 = vld [vmem:[#allocation2 + $0x18] sm:$0xff] }
  0xeb   : > { %v384_v22 = vld [vmem:[#allocation2] sm:$0xff] }
  0xec   : > { %517 = vmatmul.mubr.f32.vlgmr.msra.gmra.mxu0 %v384_v22 }
  0xed   : > { %522 = vmatprep.mubr.f32.mxu0 %v387_v23 }
  0xef   : > { %v386_v24 = vld [vmem:[#allocation2 + $0x10] sm:$0xff] }
  0xf0   : > { %523 = vmatmul.mubr.f32.gmra.mxu0 %v386_v24 }
 0x1ac   : > { %v518_v40 = vpop.f32.mrf.mxu0 }
 0x1ad   : > { %v529_v42 = vmul.f32 %v518_v40, %v518_v40 }
 0x1ae   : > { %v520_v41 = vpop.f32.mrf.mxu0 }
 0x1af   : > { %v530_v43 = vmul.f32 %v520_v41, %v520_v41 }
 0x1b0   : > { %v524_v44 = vpop.f32.mrf.mxu0 }
 0x1b1   : > { %v533_v45 = vadd.f32 %v530_v43, %v529_v42  ;;  %v531_v47 = vmul.f32 %v524_v44, %v524_v44 }
 0x1b2   : > { %v526_v46 = vpop.f32.mrf.mxu0 }
 0x1b3   : > { %v532_v48 = vmul.f32 %v526_v46, %v526_v46  ;;  %534 = vadd.xlane.f32.xlu0 %v533_v45  ;;  %v555_v49 = vadd.f32 1e-09, %v533_v45 }
 0x1b5   : > { %v536_v50 = vadd.f32 %v532_v48, %v531_v47  ;;  %995 = vrsqrt.f32 %v555_v49  ;;  %vm559_vm11 = vcmp.eq.f32.partialorder %v555_v49, inf  ;;  %v562_v54 = vand.u32 2147483648, %v555_v49 }
 0x1b6   : > { %vm561_vm12 = vcmp.eq.f32.partialorder %v555_v49, 0.0 }
 0x1b7   : > { %537 = vadd.xlane.f32.xlu1 %v536_v50  ;;  %v556_v51 = vadd.f32 1e-09, %v536_v50 }
 0x1b9   : > { %997 = vrsqrt.f32 %v556_v51  ;;  %vm566_vm13 = vcmp.eq.f32.partialorder %v556_v51, inf  ;;  %v569_v59 = vand.u32 2147483648, %v556_v51  ;;  %vm568_vm14 = vcmp.eq.f32.partialorder %v556_v51, 0.0 }
 0x1c2   : > { %v996_v52 = vpop.eup %995 }
 0x1c3   : > { %v558_v53 = vmul.f32 %v996_v52, %v555_v49 }
 0x1c5   : > { %v560_v55 = vsel %vm559_vm11, %v555_v49, %v558_v53 }
 0x1c6   : > { %v998_v56 = vpop.eup %997  ;;  %v563_v57 = vsel %vm561_vm12, %v562_v54, %v560_v55 }
 0x1c7   : > { %896 = vmatprep.mubr.f32.mxu1 %v563_v57  ;;  %v565_v58 = vmul.f32 %v998_v56, %v556_v51 }
 0x1c9   : > { %v567_v60 = vsel %vm566_vm13, %v556_v51, %v565_v58 }
 0x1ca   : > { %v570_v61 = vsel %vm568_vm14, %v569_v59, %v567_v60 }
 0x1cb   : > { %897 = vmatmul.mubr.f32.vlgmr.msra.gmra.mxu1 %v570_v61 }
 0x23c   : > { %v535_v63 = vpop.xlane.xlu0 %534 }
 0x23d   : > { %v539_v1 = vadd.f32 1.29e-07, %v535_v63 }
 0x23f   : > { %vm543_vm1 = vcmp.eq.f32.partialorder %v539_v1, inf  ;;  %v546_v19 = vand.u32 2147483648, %v539_v1  ;;  %vm545_vm3 = vcmp.eq.f32.partialorder %v539_v1, 0.0 }
 0x240   : > { %v538_v62 = vpop.xlane.xlu1 %537 }
 0x241   : > { %v540_v0 = vadd.f32 1.29e-07, %v538_v62 }
 0x243   : > { %999 = vrsqrt.f32 %v540_v0  ;;  %vm550_vm15 = vcmp.eq.f32.partialorder %v540_v0, inf  ;;  %v553_v14 = vand.u32 2147483648, %v540_v0  ;;  %vm552_vm2 = vcmp.eq.f32.partialorder %v540_v0, 0.0 }
 0x244   : > { %1001 = vrsqrt.f32 %v539_v1 }
 0x250   : > { %v1000_v6 = vpop.eup %999 }
 0x251   : > { %v1002_v8 = vpop.eup %1001  ;;  %v549_v9 = vmul.f32 %v1000_v6, %v540_v0 }
 0x252   : > { %v542_v11 = vmul.f32 %v1002_v8, %v539_v1 }
 0x253   : > { %v551_v12 = vsel %vm550_vm15, %v540_v0, %v549_v9 }
 0x254   : > { %v544_v16 = vsel %vm543_vm1, %v539_v1, %v542_v11  ;;  %v554_v18 = vsel %vm552_vm2, %v553_v14, %v551_v12 }
 0x255   : > { %v547_v22 = vsel %vm545_vm3, %v546_v19, %v544_v16 }
 0x28b   : > { %v898_v2 = vpop.f32.mrf.mxu1 }
 0x28c   : > { %v663_v3 = vmax.f32 %v898_v2, 1e-05 }
 0x28d   : > { %v653_v4 = vpop.f32.mrf.mxu1 }
 0x28e   : > { %1003 = vlog2.f32 %v663_v3  ;;  %v662_v5 = vmax.f32 %v653_v4, 1e-05 }
 0x290   : > { %1005 = vlog2.f32 %v662_v5 }
 0x29b   : > { %v1004_v13 = vpop.eup %1003 }
 0x29c   : > { %v667_v15 = vmul.f32 0.6931472, %v1004_v13 }
 0x29d   : > { %v1006_v17 = vpop.eup %1005 }
 0x29e   : > { %v672_v20 = vsel %vm670_vm0, %v554_v18, %v667_v15  ;;  %v665_v21 = vmul.f32 0.6931472, %v1006_v17 }
 0x29f   : > { %674 = vst [vmem:[%s315_s29 + $0x8] sm:$0xff] %v672_v20 }
 0x2a0   : > { %v671_v23 = vsel %vm670_vm0, %v547_v22, %v665_v21 }
 0x2a1   : > { %673 = vst [vmem:[%s315_s29] sm:$0xff] %v671_v23 }
 0x2a2   : > { %1129 = shalt.err (!%p1126_p1)
}
 0x2a3   : > { %s1130_s7 = scalar_lea.hbm %s1433_s13, 256  ;;  %s1134_s12 = scalar_lea.hbm %s1488_s4, 512 }
 0x2a4   : > { %p1131_p2 = scmp.ne.s32.totalorder %s1433_s13, %s1130_s7  ;;  %p1135_p13 = scmp.lt.s32.totalorder %s1433_s13, %s1488_s4 }
 0x2a5   : > { %p1136_p0 = scmp.lt.s32.totalorder %s1134_s12, %s1130_s7 }
 0x2a6   : > { %p1132_p6 = pnand %p1131_p2, %p1341_p9 }
 0x2a7   : > { %p1137_p12 = por %p1136_p0, %p1135_p13 }
 0x2a8   : > { %p1133_p8 = pneg %p1132_p6 }
 0x2aa   : > { %p1138_p4 = pnand %p1137_p12, %p1133_p8 }
 0x2ac   : > { %1141 = shalt.err (!%p1138_p4)
}
 0x2ad   : > { %s1220_s17 = smov 128   ;;  %s1221_s19 = smov 8  }
 0x2ae   : > { %912 = dma.vmem_to_hbm [thread:$0]  (%p1341_p9), %s1435_s5, 256, %s1433_s13, %s676_s18, %s1220_s17, %s1220_s17, %s1221_s19  }
 0x2af PF: > { %s706_s25 = sand.u32 1, %s1188_s15   ;;  %p1516_p3 = scmp.ne.s32.totalorder %s1500_s24, 0 }
 0x2b0   : > { %p1517_p7 = scmp.ge.s32.totalorder %s1208_s20, 2  ;;  %s707_s11 = scalar_lea.sflag [#allocation5], %s706_s25 }
 0x2b2   : > { %p929_p11 = pnand %p1517_p7, %p1516_p3 }
 0x2b4   : > { %p930_p5 = pneg %p929_p11 }
 0x2b6   : > { %1183 = dma.done.wait (%p930_p5), %s707_s11, 256  }
 0x2b7   : > { %1185 = vsyncadd (%p930_p5), %s707_s11, 4294967040  ;;  %s24_s20 = sadd.s32 1, %s1208_s20   ;;  %s1518_s22 = sld [smem:[#allocation17_spill]] }
 0x2b8   : > { %p21_p10 = scmp.ge.s32.totalorder %s24_s20, 4   ;;  %s1519_s17 = sld [smem:[#allocation20_spill]] }
 0x2b9   : > { %s1520_s18 = sld [smem:[#allocation18_spill]]  ;;  %s1522_s15 = smov %s1192_s16 }
 0x2ba   : > { %s1521_s19 = sld [smem:[#allocation19_spill]]  ;;  %23 = sbr.rel (!%p21_p10) target bundleno = 13 (0xd), region = 102 }
 0x2bd   : > { %s1523_s16 = smov %s1518_s22 }
 0x2bf   :  { %712 = vsyncpa [#allocation4], 1 }
 0x2c0   :  { %714 = vsyncpa [#allocation4 + $0x1], 1 }
 0x2c1   :  { %715 = vsyncpa [#allocation7], 1 }
 0x2c2   :  { %717 = vsyncpa [#allocation7 + $0x1], 1 }
 0x2c3   :  { %718 = vsyncpa [#allocation10], 1 }
 0x2c4   :  { %719 = vsyncpa [#allocation5], 1 }
 0x2c5   :  { %721 = vsyncpa [#allocation5 + $0x1], 1 }

</bundles_post_ra>
